<compile_context>
chip_gen: v5e
topology: v5e:2x2
jax: 0.10.0
libtpu: 0.0.40
codegen_flags: <defaults>
</compile_context>

<pallas_src>
import jax
import jax.numpy as jnp
from jax.experimental import pallas as pl
from jax.experimental.pallas import tpu as pltpu

BN_EPS = 1e-5
MXU_DTYPE = jnp.bfloat16   # MXU operands only; elementwise + accumulation stay f32


def baseline_kernel(x_ref, w1t_ref, b1_ref, wct_ref, bct_ref, out_ref, acc_ref):
    # x_ref:   (1, C, HW_TILE)  NCHW activations (HW on the lane axis)
    # w1t_ref: (F, C)  bf16     backbone 1x1-conv weight, transposed (pre-cast in wrapper)
    # b1_ref:  (F, 1)  f32      backbone bias
    # wct_ref: (F, K_pad) f32   classifier weight with BN + 1/HW folded in
    # bct_ref: (1, K_pad) f32   classifier bias with BN folded in
    # out_ref: (1, 1, K_pad)    per-image sigmoid(logits), K lane-dense
    # acc_ref: (F, 1) f32       running sum-pool of relu(conv) over HW tiles
    h = pl.program_id(1)

    @pl.when(h == 0)
    def _init():
        acc_ref[...] = jnp.zeros_like(acc_ref)

    # Backbone stand-in: 1x1 conv (channel matmul) + bias + ReLU, reduced over
    # this HW tile immediately (XLU lane reduction) so only an (F, 1) partial
    # sum is carried across grid steps (no full-width accumulator writeback).
    x_t = x_ref[0].astype(MXU_DTYPE)                                          # (C, HW_TILE)
    feat_t = jnp.dot(w1t_ref[...], x_t, preferred_element_type=jnp.float32)   # (F, HW_TILE)
    relu_t = jnp.maximum(feat_t + b1_ref[...], 0.0)                           # f32 VPU
    acc_ref[...] += jnp.sum(relu_t, axis=1, keepdims=True)                    # (F, 1) XLU

    # Finalize: pooled sum -> (BN + 1/HW folded) Linear -> sigmoid, lane-dense K.
    @pl.when(h == pl.num_programs(1) - 1)
    def _finalize():
        pooled = acc_ref[...]                                                 # (F, 1)
        logits = jnp.sum(wct_ref[...] * pooled, axis=0, keepdims=True)        # (1, K_pad)
        logits = logits + bct_ref[...]
        out_ref[0] = jax.nn.sigmoid(logits)                                   # is_inference


def _vmem_capacity_bytes():
    try:
        return int(pltpu.get_tpu_info().vmem_capacity_bytes)
    except Exception:
        return 64 * 1024 * 1024          # conservative (v7x per-core) fallback


def _pick_hw_tile(hw, c, f, vmem_budget):
    # Largest lane-aligned tile dividing HW whose per-step footprint
    # (double-buffered x block + matmul/ReLU temporaries) fits a quarter of
    # the VMEM budget; prefer >= 2 grid steps so the HW reduction is pipelined.
    def fits(t):
        return 2 * c * t * 4 + 3 * f * t * 4 <= vmem_budget // 4
    for t in (2048, 1024, 512, 256, 128):
        if hw % t == 0 and hw // t >= 2 and fits(t):
            return t
    for t in (2048, 1024, 512, 256, 128):
        if hw % t == 0 and fits(t):
            return t
    return hw    # non-128-multiple HW (e.g. 7x7): single full block; still correct


def _fold_head(params, hw):
    # Fold BatchNorm1d (inference, running stats) and the 1/HW mean factor into
    # the classifier Linear, so the kernel computes logits = pooled_sum @ wc' + bc'.
    s = params['gamma'] * jax.lax.rsqrt(params['var'] + BN_EPS)                  # (1, F)
    wc_fold = params['wc'] * (s / hw).T                                          # (F, K)
    bc_fold = params['bc'] + (params['beta'] - params['mu'] * s) @ params['wc']  # (1, K)
    return wc_fold, bc_fold


def baseline_forward(x_nchw, params):
    B, C, H, W = x_nchw.shape
    HW = H * W
    F = params['w1'].shape[1]
    K = params['wc'].shape[1]
    K_pad = ((K + 127) // 128) * 128            # lane-align the class dim

    vmem_cap = _vmem_capacity_bytes()
    vmem_budget = int(0.75 * vmem_cap)          # leave pipeline headroom
    hw_tile = _pick_hw_tile(HW, C, F, vmem_budget)
    assert HW % hw_tile == 0                    # exact tiling: no padded pixels in pooled sum
    num_hw = HW // hw_tile

    # Free reshape: NCHW -> (B, C, H*W); the layout change is absorbed into the
    # backbone matmul (contract over C), so no wrapper transpose / HBM pass.
    x = x_nchw.reshape(B, C, HW)

    # One-time parameter prep (the bf16 weight cast is hoisted out of the kernel).
    w1t = params['w1'].T.astype(MXU_DTYPE)                      # (F, C) bf16
    b1c = params['b1'].reshape(1, F).T                          # (F, 1) f32
    wc_fold, bc_fold = _fold_head(params, HW)
    wct = jnp.zeros((F, K_pad), jnp.float32).at[:, :K].set(wc_fold)
    bct = jnp.zeros((1, K_pad), jnp.float32).at[:, :K].set(bc_fold)

    # VMEM limit derived from the actual block/scratch/temporary sizes, clamped
    # to 75% of physical VMEM (works unchanged on v5e / v6e / v7x).
    needed = (2 * C * hw_tile * 4        # x block, double-buffered
              + 2 * F * C * 2            # w1t (bf16), worst-case double-buffered
              + 2 * F * 4                # b1
              + 2 * F * K_pad * 4        # wct
              + 2 * K_pad * 4            # bct
              + 2 * K_pad * 4            # out
              + F * 4                    # acc scratch
              + 3 * F * hw_tile * 4)     # matmul / ReLU temporaries
    vmem_limit = int(min(max(2 * needed, 32 * 1024 * 1024), vmem_budget))

    cost = pl.CostEstimate(
        flops=2 * B * HW * C * F + 3 * B * F * K_pad,
        transcendentals=B * K_pad,
        bytes_accessed=(x.size * 4 + w1t.size * 2
                        + (b1c.size + wct.size + bct.size + B * K_pad) * 4),
    )

    def call(single_buffer_consts):
        # Grid-invariant params: keep a single resident VMEM copy when the
        # installed jax supports pipeline_mode=pl.Buffered(1); otherwise fall
        # back to default buffering (still only fetched once, just 2 buffers).
        if single_buffer_consts:
            def const_spec(shape):
                return pl.BlockSpec(shape, lambda b, h: (0,) * len(shape),
                                    pipeline_mode=pl.Buffered(1))
        else:
            def const_spec(shape):
                return pl.BlockSpec(shape, lambda b, h: (0,) * len(shape))

        return pl.pallas_call(
            baseline_kernel,
            out_shape=jax.ShapeDtypeStruct((B, 1, K_pad), jnp.float32),
            grid_spec=pltpu.PrefetchScalarGridSpec(
                num_scalar_prefetch=0,
                grid=(B, num_hw),
                in_specs=[
                    pl.BlockSpec((1, C, hw_tile), lambda b, h: (b, 0, h)),
                    const_spec((F, C)),
                    const_spec((F, 1)),
                    const_spec((F, K_pad)),
                    const_spec((1, K_pad)),
                ],
                out_specs=pl.BlockSpec((1, 1, K_pad), lambda b, h: (b, 0, 0)),
                scratch_shapes=[pltpu.VMEM((F, 1), jnp.float32)],
            ),
            compiler_params=pltpu.CompilerParams(
                # TODO(synk): on v7x with per-device B == 1, split F across a
                # second "parallel" grid axis so both TensorCores stay busy.
                dimension_semantics=("parallel", "arbitrary"),
                vmem_limit_bytes=vmem_limit,
            ),
            cost_estimate=cost,
        )(x, w1t, b1c, wct, bct)

    try:
        out = call(True)
    except Exception:          # older jax without pipeline_mode / Buffered(1)
        out = call(False)

    return out[:, 0, :K]                                        # (B, num_classes)


def baseline_reference(x_nchw, params):
    # Pure-JAX reference (mirrors the original un-fused forward) for validation.
    B, C, H, W = x_nchw.shape
    xc = jnp.transpose(x_nchw, (0, 2, 3, 1)).reshape(B, H * W, C)
    feat = jnp.einsum('bhc,cf->bhf', xc, params['w1']) + params['b1'][None]
    feat = jnp.maximum(feat, 0.0)
    pooled = jnp.mean(feat, axis=1)
    inv_std = jax.lax.rsqrt(params['var'] + BN_EPS)
    normed = (pooled - params['mu']) * inv_std * params['gamma'] + params['beta']
    logits = normed @ params['wc'] + params['bc']
    return jax.nn.sigmoid(logits)


def make_params(key, in_ch, feature_dim, num_classes):
    k1, k2, k3, k4 = jax.random.split(key, 4)
    return dict(
        w1=jax.random.normal(k1, (in_ch, feature_dim), jnp.float32) * 0.1,
        b1=jnp.zeros((1, feature_dim), jnp.float32),
        gamma=jnp.ones((1, feature_dim), jnp.float32),
        beta=jnp.zeros((1, feature_dim), jnp.float32),
        mu=jax.random.normal(k2, (1, feature_dim), jnp.float32) * 0.01,
        var=jnp.ones((1, feature_dim), jnp.float32)
            + 0.1 * jax.random.uniform(k3, (1, feature_dim), jnp.float32),
        wc=jax.random.normal(k4, (feature_dim, num_classes), jnp.float32) * 0.1,
        bc=jnp.zeros((1, num_classes), jnp.float32),
    )


if __name__ == "__main__":
    key = jax.random.PRNGKey(0)
    k_x, k_p = jax.random.split(key)

    B, C, H, W = 2, 4, 16, 16
    feature_dim = 32
    num_classes = 8

    x = jax.random.normal(k_x, (B, C, H, W), jnp.float32)
    params = make_params(k_p, C, feature_dim, num_classes)

    out = jax.block_until_ready(baseline_forward(x, params))
    ref = jax.block_until_ready(baseline_reference(x, params))

    assert out.shape == (B, num_classes)
    assert bool(jnp.all(jnp.isfinite(out)))
    assert bool(jnp.allclose(out, ref, atol=1e-2, rtol=1e-2))
    print("KERNEL_OK")
</pallas_src>

<mosaic_0001>
module attributes {stable_mosaic.version = 11 : i64} {
  func.func @baseline_kernel(%arg0: i32, %arg1: i32, %arg2: memref<1x4x128xf32, #tpu.memory_space<vmem>>, %arg3: memref<32x4xbf16, #tpu.memory_space<vmem>>, %arg4: memref<32x1xf32, #tpu.memory_space<vmem>>, %arg5: memref<32x128xf32, #tpu.memory_space<vmem>>, %arg6: memref<1x128xf32, #tpu.memory_space<vmem>>, %arg7: memref<1x1x128xf32, #tpu.memory_space<vmem>>, %arg8: memref<32x1xf32, #tpu.memory_space<vmem>>) attributes {dimension_semantics = [#tpu.dimension_semantics<parallel>, #tpu.dimension_semantics<arbitrary>], iteration_bounds = array<i64: 2, 2>, scalar_prefetch = 0 : i64, scratch_operands = 1 : i64, tpu.core_type = #tpu.core_type<tc>, window_params = [{transform_indices = @transform_0, window_bounds = array<i64: 1, 4, 128>}, {pipeline_mode = #tpu.pipeline_mode<synchronous>, transform_indices = @transform_1, window_bounds = array<i64: 32, 4>}, {pipeline_mode = #tpu.pipeline_mode<synchronous>, transform_indices = @transform_2, window_bounds = array<i64: 32, 1>}, {pipeline_mode = #tpu.pipeline_mode<synchronous>, transform_indices = @transform_3, window_bounds = array<i64: 32, 128>}, {pipeline_mode = #tpu.pipeline_mode<synchronous>, transform_indices = @transform_4, window_bounds = array<i64: 1, 128>}, {transform_indices = @transform_5, window_bounds = array<i64: 1, 1, 128>}]} {
    %c0_i32 = arith.constant 0 : i32
    %0 = arith.cmpi eq, %arg1, %c0_i32 : i32
    %1 = arith.extui %0 : i1 to i32
    %c0_i32_0 = arith.constant 0 : i32
    %2 = arith.cmpi ne, %1, %c0_i32_0 : i32
    scf.if %2 {
      %cst_14 = arith.constant 0.000000e+00 : f32
      %21 = vector.broadcast %cst_14 : f32 to vector<32x1xf32>
      %c0_15 = arith.constant 0 : index
      %c0_16 = arith.constant 0 : index
      %22 = vector.load %arg8[%c0_15, %c0_16] : memref<32x1xf32, #tpu.memory_space<vmem>>, vector<32x1xf32>
      tpu.vector_store %arg8[%c0_15, %c0_16], %21 {strides = array<i32>} : memref<32x1xf32, #tpu.memory_space<vmem>>, vector<32x1xf32>,
    } else {
    }
    %c0 = arith.constant 0 : index
    %c0_1 = arith.constant 0 : index
    %c0_2 = arith.constant 0 : index
    %3 = vector.load %arg2[%c0, %c0_1, %c0_2] : memref<1x4x128xf32, #tpu.memory_space<vmem>>, vector<1x4x128xf32>
    %4 = vector.shape_cast %3 : vector<1x4x128xf32> to vector<4x128xf32>
    %5 = arith.truncf %4 : vector<4x128xf32> to vector<4x128xbf16>
    %c0_3 = arith.constant 0 : index
    %c0_4 = arith.constant 0 : index
    %6 = vector.load %arg3[%c0_3, %c0_4] : memref<32x4xbf16, #tpu.memory_space<vmem>>, vector<32x4xbf16>
    %cst = arith.constant dense<0.000000e+00> : vector<32x128xf32>
    %7 = tpu.matmul %6, %5, %cst {dimension_numbers = #tpu.dot_dimension_numbers<[1], [0], [0], [1], [0, 0, 1, 1], [], []>} : vector<32x4xbf16>, vector<4x128xbf16>, vector<32x128xf32> -> vector<32x128xf32>
    %c0_5 = arith.constant 0 : index
    %c0_6 = arith.constant 0 : index
    %8 = vector.load %arg4[%c0_5, %c0_6] : memref<32x1xf32, #tpu.memory_space<vmem>>, vector<32x1xf32>
    %9 = vector.broadcast %8 : vector<32x1xf32> to vector<32x128xf32>
    %10 = arith.addf %7, %9 : vector<32x128xf32>
    %cst_7 = arith.constant 0.000000e+00 : f32
    %11 = vector.broadcast %cst_7 : f32 to vector<32x128xf32>
    %12 = arith.maximumf %10, %11 : vector<32x128xf32>
    %c0_8 = arith.constant 0 : index
    %c0_9 = arith.constant 0 : index
    %13 = vector.load %arg8[%c0_8, %c0_9] : memref<32x1xf32, #tpu.memory_space<vmem>>, vector<32x1xf32>
    %cst_10 = arith.constant dense<0.000000e+00> : vector<32xf32>
    %14 = vector.multi_reduction <add>, %12, %cst_10 [1] : vector<32x128xf32> to vector<32xf32>
    %15 = vector.shape_cast %14 : vector<32xf32> to vector<32x1xf32>
    %16 = arith.addf %13, %15 : vector<32x1xf32>
    %c0_11 = arith.constant 0 : index
    %c0_12 = arith.constant 0 : index
    %17 = vector.load %arg8[%c0_11, %c0_12] : memref<32x1xf32, #tpu.memory_space<vmem>>, vector<32x1xf32>
    tpu.vector_store %arg8[%c0_11, %c0_12], %16 {strides = array<i32>} : memref<32x1xf32, #tpu.memory_space<vmem>>, vector<32x1xf32>,
    %c1_i32 = arith.constant 1 : i32
    %18 = arith.cmpi eq, %arg1, %c1_i32 : i32
    %19 = arith.extui %18 : i1 to i32
    %c0_i32_13 = arith.constant 0 : i32
    %20 = arith.cmpi ne, %19, %c0_i32_13 : i32
    scf.if %20 {
      %c0_14 = arith.constant 0 : index
      %c0_15 = arith.constant 0 : index
      %21 = vector.load %arg8[%c0_14, %c0_15] : memref<32x1xf32, #tpu.memory_space<vmem>>, vector<32x1xf32>
      %c0_16 = arith.constant 0 : index
      %c0_17 = arith.constant 0 : index
      %22 = vector.load %arg5[%c0_16, %c0_17] : memref<32x128xf32, #tpu.memory_space<vmem>>, vector<32x128xf32>
      %23 = vector.broadcast %21 : vector<32x1xf32> to vector<32x128xf32>
      %24 = arith.mulf %22, %23 : vector<32x128xf32>
      %cst_18 = arith.constant dense<0.000000e+00> : vector<128xf32>
      %25 = vector.multi_reduction <add>, %24, %cst_18 [0] : vector<32x128xf32> to vector<128xf32>
      %26 = vector.shape_cast %25 : vector<128xf32> to vector<1x128xf32>
      %c0_19 = arith.constant 0 : index
      %c0_20 = arith.constant 0 : index
      %27 = vector.load %arg6[%c0_19, %c0_20] : memref<1x128xf32, #tpu.memory_space<vmem>>, vector<1x128xf32>
      %28 = arith.addf %26, %27 : vector<1x128xf32>
      %29 = arith.negf %28 : vector<1x128xf32>
      %30 = math.exp %29 : vector<1x128xf32>
      %cst_21 = arith.constant 1.000000e+00 : f32
      %31 = vector.broadcast %cst_21 : f32 to vector<1x128xf32>
      %32 = arith.addf %31, %30 : vector<1x128xf32>
      %33 = arith.divf %31, %32 : vector<1x128xf32>
      %c0_22 = arith.constant 0 : index
      %c0_23 = arith.constant 0 : index
      %c0_24 = arith.constant 0 : index
      %34 = vector.load %arg7[%c0_22, %c0_23, %c0_24] : memref<1x1x128xf32, #tpu.memory_space<vmem>>, vector<1x1x128xf32>
      %35 = vector.shape_cast %34 : vector<1x1x128xf32> to vector<1x128xf32>
      %36 = vector.shape_cast %33 : vector<1x128xf32> to vector<1x1x128xf32>
      tpu.vector_store %arg7[%c0_22, %c0_23, %c0_24], %36 {strides = array<i32>} : memref<1x1x128xf32, #tpu.memory_space<vmem>>, vector<1x1x128xf32>,
    } else {
    }
    return
  }
  func.func @transform_0(%arg0: i32, %arg1: i32) -> (i32, i32, i32) {
    %c0_i32 = arith.constant 0 : i32
    %c0_i32_0 = arith.constant 0 : i32
    return %arg0, %c0_i32, %arg1 : i32, i32, i32
  }
  func.func @transform_1(%arg0: i32, %arg1: i32) -> (i32, i32) {
    %c0_i32 = arith.constant 0 : i32
    %c0_i32_0 = arith.constant 0 : i32
    %c0_i32_1 = arith.constant 0 : i32
    return %c0_i32, %c0_i32_0 : i32, i32
  }
  func.func @transform_2(%arg0: i32, %arg1: i32) -> (i32, i32) {
    %c0_i32 = arith.constant 0 : i32
    %c0_i32_0 = arith.constant 0 : i32
    %c0_i32_1 = arith.constant 0 : i32
    return %c0_i32, %c0_i32_0 : i32, i32
  }
  func.func @transform_3(%arg0: i32, %arg1: i32) -> (i32, i32) {
    %c0_i32 = arith.constant 0 : i32
    %c0_i32_0 = arith.constant 0 : i32
    %c0_i32_1 = arith.constant 0 : i32
    return %c0_i32, %c0_i32_0 : i32, i32
  }
  func.func @transform_4(%arg0: i32, %arg1: i32) -> (i32, i32) {
    %c0_i32 = arith.constant 0 : i32
    %c0_i32_0 = arith.constant 0 : i32
    %c0_i32_1 = arith.constant 0 : i32
    return %c0_i32, %c0_i32_0 : i32, i32
  }
  func.func @transform_5(%arg0: i32, %arg1: i32) -> (i32, i32, i32) {
    %c0_i32 = arith.constant 0 : i32
    %c0_i32_0 = arith.constant 0 : i32
    %c0_i32_1 = arith.constant 0 : i32
    return %arg0, %c0_i32, %c0_i32_0 : i32, i32, i32
  }
}

module attributes {stable_mosaic.version = 11 : i64} {
  func.func @baseline_kernel(%arg0: i32, %arg1: i32, %arg2: memref<1x4x128xf32, #tpu.memory_space<vmem>>, %arg3: memref<32x4xbf16, #tpu.memory_space<vmem>>, %arg4: memref<32x1xf32, #tpu.memory_space<vmem>>, %arg5: memref<32x128xf32, #tpu.memory_space<vmem>>, %arg6: memref<1x128xf32, #tpu.memory_space<vmem>>, %arg7: memref<1x1x128xf32, #tpu.memory_space<vmem>>, %arg8: memref<32x1xf32, #tpu.memory_space<vmem>>) attributes {dimension_semantics = [#tpu.dimension_semantics<parallel>, #tpu.dimension_semantics<arbitrary>], iteration_bounds = array<i64: 2, 2>, scalar_prefetch = 0 : i64, scratch_operands = 1 : i64, tpu.core_type = #tpu.core_type<tc>, window_params = [{transform_indices = @transform_0, window_bounds = array<i64: 1, 4, 128>}, {pipeline_mode = #tpu.pipeline_mode<synchronous>, transform_indices = @transform_1, window_bounds = array<i64: 32, 4>}, {pipeline_mode = #tpu.pipeline_mode<synchronous>, transform_indices = @transform_2, window_bounds = array<i64: 32, 1>}, {pipeline_mode = #tpu.pipeline_mode<synchronous>, transform_indices = @transform_3, window_bounds = array<i64: 32, 128>}, {pipeline_mode = #tpu.pipeline_mode<synchronous>, transform_indices = @transform_4, window_bounds = array<i64: 1, 128>}, {transform_indices = @transform_5, window_bounds = array<i64: 1, 1, 128>}]} {
    %c0_i32 = arith.constant 0 : i32
    %0 = arith.cmpi eq, %arg1, %c0_i32 : i32
    %1 = arith.extui %0 : i1 to i32
    %c0_i32_0 = arith.constant 0 : i32
    %2 = arith.cmpi ne, %1, %c0_i32_0 : i32
    scf.if %2 {
      %cst_14 = arith.constant 0.000000e+00 : f32
      %21 = vector.broadcast %cst_14 : f32 to vector<32x1xf32>
      %c0_15 = arith.constant 0 : index
      %c0_16 = arith.constant 0 : index
      %22 = vector.load %arg8[%c0_15, %c0_16] : memref<32x1xf32, #tpu.memory_space<vmem>>, vector<32x1xf32>
      tpu.vector_store %arg8[%c0_15, %c0_16], %21 {strides = array<i32>} : memref<32x1xf32, #tpu.memory_space<vmem>>, vector<32x1xf32>,
    } else {
    }
    %c0 = arith.constant 0 : index
    %c0_1 = arith.constant 0 : index
    %c0_2 = arith.constant 0 : index
    %3 = vector.load %arg2[%c0, %c0_1, %c0_2] : memref<1x4x128xf32, #tpu.memory_space<vmem>>, vector<1x4x128xf32>
    %4 = vector.shape_cast %3 : vector<1x4x128xf32> to vector<4x128xf32>
    %5 = arith.truncf %4 : vector<4x128xf32> to vector<4x128xbf16>
    %c0_3 = arith.constant 0 : index
    %c0_4 = arith.constant 0 : index
    %6 = vector.load %arg3[%c0_3, %c0_4] : memref<32x4xbf16, #tpu.memory_space<vmem>>, vector<32x4xbf16>
    %cst = arith.constant dense<0.000000e+00> : vector<32x128xf32>
    %7 = tpu.matmul %6, %5, %cst {dimension_numbers = #tpu.dot_dimension_numbers<[1], [0], [0], [1], [0, 0, 1, 1], [], []>} : vector<32x4xbf16>, vector<4x128xbf16>, vector<32x128xf32> -> vector<32x128xf32>
    %c0_5 = arith.constant 0 : index
    %c0_6 = arith.constant 0 : index
    %8 = vector.load %arg4[%c0_5, %c0_6] : memref<32x1xf32, #tpu.memory_space<vmem>>, vector<32x1xf32>
    %9 = vector.broadcast %8 : vector<32x1xf32> to vector<32x128xf32>
    %10 = arith.addf %7, %9 : vector<32x128xf32>
    %cst_7 = arith.constant 0.000000e+00 : f32
    %11 = vector.broadcast %cst_7 : f32 to vector<32x128xf32>
    %12 = arith.maximumf %10, %11 : vector<32x128xf32>
    %c0_8 = arith.constant 0 : index
    %c0_9 = arith.constant 0 : index
    %13 = vector.load %arg8[%c0_8, %c0_9] : memref<32x1xf32, #tpu.memory_space<vmem>>, vector<32x1xf32>
    %cst_10 = arith.constant dense<0.000000e+00> : vector<32xf32>
    %14 = vector.multi_reduction <add>, %12, %cst_10 [1] : vector<32x128xf32> to vector<32xf32>
    %15 = vector.shape_cast %14 : vector<32xf32> to vector<32x1xf32>
    %16 = arith.addf %13, %15 : vector<32x1xf32>
    %c0_11 = arith.constant 0 : index
    %c0_12 = arith.constant 0 : index
    %17 = vector.load %arg8[%c0_11, %c0_12] : memref<32x1xf32, #tpu.memory_space<vmem>>, vector<32x1xf32>
    tpu.vector_store %arg8[%c0_11, %c0_12], %16 {strides = array<i32>} : memref<32x1xf32, #tpu.memory_space<vmem>>, vector<32x1xf32>,
    %c1_i32 = arith.constant 1 : i32
    %18 = arith.cmpi eq, %arg1, %c1_i32 : i32
    %19 = arith.extui %18 : i1 to i32
    %c0_i32_13 = arith.constant 0 : i32
    %20 = arith.cmpi ne, %19, %c0_i32_13 : i32
    scf.if %20 {
      %c0_14 = arith.constant 0 : index
      %c0_15 = arith.constant 0 : index
      %21 = vector.load %arg8[%c0_14, %c0_15] : memref<32x1xf32, #tpu.memory_space<vmem>>, vector<32x1xf32>
      %c0_16 = arith.constant 0 : index
      %c0_17 = arith.constant 0 : index
      %22 = vector.load %arg5[%c0_16, %c0_17] : memref<32x128xf32, #tpu.memory_space<vmem>>, vector<32x128xf32>
      %23 = vector.broadcast %21 : vector<32x1xf32> to vector<32x128xf32>
      %24 = arith.mulf %22, %23 : vector<32x128xf32>
      %cst_18 = arith.constant dense<0.000000e+00> : vector<128xf32>
      %25 = vector.multi_reduction <add>, %24, %cst_18 [0] : vector<32x128xf32> to vector<128xf32>
      %26 = vector.shape_cast %25 : vector<128xf32> to vector<1x128xf32>
      %c0_19 = arith.constant 0 : index
      %c0_20 = arith.constant 0 : index
      %27 = vector.load %arg6[%c0_19, %c0_20] : memref<1x128xf32, #tpu.memory_space<vmem>>, vector<1x128xf32>
      %28 = arith.addf %26, %27 : vector<1x128xf32>
      %29 = arith.negf %28 : vector<1x128xf32>
      %30 = math.exp %29 : vector<1x128xf32>
      %cst_21 = arith.constant 1.000000e+00 : f32
      %31 = vector.broadcast %cst_21 : f32 to vector<1x128xf32>
      %32 = arith.addf %31, %30 : vector<1x128xf32>
      %33 = arith.divf %31, %32 : vector<1x128xf32>
      %c0_22 = arith.constant 0 : index
      %c0_23 = arith.constant 0 : index
      %c0_24 = arith.constant 0 : index
      %34 = vector.load %arg7[%c0_22, %c0_23, %c0_24] : memref<1x1x128xf32, #tpu.memory_space<vmem>>, vector<1x1x128xf32>
      %35 = vector.shape_cast %34 : vector<1x1x128xf32> to vector<1x128xf32>
      %36 = vector.shape_cast %33 : vector<1x128xf32> to vector<1x1x128xf32>
      tpu.vector_store %arg7[%c0_22, %c0_23, %c0_24], %36 {strides = array<i32>} : memref<1x1x128xf32, #tpu.memory_space<vmem>>, vector<1x1x128xf32>,
    } else {
    }
    return
  }
  func.func @transform_0(%arg0: i32, %arg1: i32) -> (i32, i32, i32) {
    %c0_i32 = arith.constant 0 : i32
    %c0_i32_0 = arith.constant 0 : i32
    return %arg0, %c0_i32, %arg1 : i32, i32, i32
  }
  func.func @transform_1(%arg0: i32, %arg1: i32) -> (i32, i32) {
    %c0_i32 = arith.constant 0 : i32
    %c0_i32_0 = arith.constant 0 : i32
    %c0_i32_1 = arith.constant 0 : i32
    return %c0_i32, %c0_i32_0 : i32, i32
  }
  func.func @transform_2(%arg0: i32, %arg1: i32) -> (i32, i32) {
    %c0_i32 = arith.constant 0 : i32
    %c0_i32_0 = arith.constant 0 : i32
    %c0_i32_1 = arith.constant 0 : i32
    return %c0_i32, %c0_i32_0 : i32, i32
  }
  func.func @transform_3(%arg0: i32, %arg1: i32) -> (i32, i32) {
    %c0_i32 = arith.constant 0 : i32
    %c0_i32_0 = arith.constant 0 : i32
    %c0_i32_1 = arith.constant 0 : i32
    return %c0_i32, %c0_i32_0 : i32, i32
  }
  func.func @transform_4(%arg0: i32, %arg1: i32) -> (i32, i32) {
    %c0_i32 = arith.constant 0 : i32
    %c0_i32_0 = arith.constant 0 : i32
    %c0_i32_1 = arith.constant 0 : i32
    return %c0_i32, %c0_i32_0 : i32, i32
  }
  func.func @transform_5(%arg0: i32, %arg1: i32) -> (i32, i32, i32) {
    %c0_i32 = arith.constant 0 : i32
    %c0_i32_0 = arith.constant 0 : i32
    %c0_i32_1 = arith.constant 0 : i32
    return %arg0, %c0_i32, %c0_i32_0 : i32, i32, i32
  }
}

</mosaic_0001>

<bundles_post_ra>
// kernel: tpu_custom_call.1
= control target key start
LH: loop header
LB: loop body
LE: loop exit
PB: predicated region body
PF: predicated region fallthrough
CT: control target
= control target key end

     0   :  { %10 = vsyncpa [#allocation4], 0  ;;  %s900_s0 = inlined_call_operand.vmem [shape: f32[2,4,256], index: 0, kind: input, shape index: {}]   ;;  %s901_s1 = inlined_call_operand.vmem [shape: bf16[32,4], index: 1, kind: input, shape index: {}]   ;;  %s902_s2 = inlined_call_operand.vmem [shape: f32[32,1], index: 2, kind: input, shape index: {}]   ;;  %s903_s3 = inlined_call_operand.vmem [shape: f32[32,128], index: 3, kind: input, shape index: {}]   ;;  %s904_s4 = inlined_call_operand.vmem [shape: f32[1,128], index: 4, kind: input, shape index: {}]   ;;  %s905_s5 = inlined_call_operand.hbm [shape: f32[2,1,128], index: 5, kind: output, shape index: {}]  }
   0x1   :  { %12 = vsyncpa [#allocation4 + $0x1], 0  ;;  %s738_s18 = smov 0   ;;  %s740_s19 = smov 0  }
   0x2   :  { %s742_s20 = smov 0   ;;  %s744_s21 = smov 0  }
   0x3   :  { %s746_s22 = smov 0   ;;  %s748_s23 = smov 0  }
   0x4   :  { %s750_s24 = smov 0   ;;  %s752_s25 = smov 0  }
   0x5 LB: > { %s502_s26 = sadd.s32 4294967295, %s703_s25   ;;  %s503_s27 = sadd.s32 4294967294, %s703_s25   ;;  %s703_s25 = sphi %s752_s25, %s18_s25   ;;  %s699_s24 = sphi %s750_s24, %s914_s24   ;;  %s695_s23 = sphi %s748_s23, %s913_s23   ;;  %s691_s22 = sphi %s746_s22, %s912_s22   ;;  %s687_s21 = sphi %s744_s21, %s911_s21   ;;  %s683_s20 = sphi %s742_s20, %s910_s20   ;;  %s679_s19 = sphi %s740_s19, %s909_s19   ;;  %s675_s18 = sphi %s738_s18, %s908_s18  }
   0x6   : > { %s27_s28 = sadd.s32 1, %s695_s23  ;;  %s30_s29 = sadd.s32 1, %s699_s24 }
   0x7   : > { %p28_p0 = scmp.ge.s32.totalorder %s27_s28, 2  ;;  %p159_p1 = scmp.ne.s32.totalorder %s683_s20, %s679_s19 }
   0x8   : > { %p160_p2 = scmp.eq.s32.totalorder %s502_s26, 3  ;;  %p165_p4 = scmp.ne.s32.totalorder %s679_s19, %s675_s18 }
   0x9   : > { %s916_s28 = smov (%p28_p0, %s27_s28), 0  ;;  %s918_s29 = smov (!%p28_p0, %s30_s29), %s699_s24 }
   0xa   : > { %p787_p3 = por %p160_p2, %p159_p1  ;;  %p32_p5 = scmp.ge.s32.totalorder %s918_s29, 2 }
   0xb   : > { %p166_p6 = scmp.eq.s32.totalorder %s503_s27, 3  ;;  %p506_p7 = scmp.ge.s32.totalorder %s703_s25, 1 }
   0xc   : > { %p207_p8 = scmp.lt.s32.totalorder %s703_s25, 5  ;;  %s920_s29 = smov (%p32_p5, %s918_s29), 0 }
   0xd   : > { %p797_p9 = por %p166_p6, %p165_p4  ;;  %s146_s7 = ssub.s32 %s699_s24, %s920_s29 }
   0xe   : > { %p208_p10 = pnand %p506_p7, %p207_p8  ;;  %s149_s8 = sadd.s32 1, %s683_s20 }
   0xf   : > { %p147_p11 = scmp.eq.s32.totalorder %s146_s7, 0  ;;  %s235_s10 = sand.u32 (!%p208_p10), 1, %s679_s19  }
  0x10   : > { %211 = sbr.rel (%p208_p10) target bundleno = 488 (0x1e8), region = 40  ;;  %p237_p12 = scmp.lt.s32.totalorder (!%p208_p10), %s691_s22, 1 }
  0x11   : > { %s805_s9 = scalar_select %p147_p11, %s683_s20, %s149_s8  }
  0x12   : > { %p239_p13 = scmp.lt.s32.totalorder (!%p208_p10), %s687_s21, 1  ;;  %s817_s27 = scalar_lea.vmem (!%p208_p10), [#allocation3], %s235_s10 }
  0x13   : > { %p509_p0 = scmp.ne.s32.totalorder (!%p208_p10), %s687_s21, 0 }
  0x15   : > { %s238_s11 = scalar_select %p237_p12, %s691_s22, 1 }
  0x16   : > { %s240_s12 = scalar_select %p239_p13, %s687_s21, 1 }
  0x17   : > { %s507_s13 = sshll.u32 %s238_s11, 1  ;;  %249 = sbr.rel (%p509_p0) target bundleno = 33 (0x21), region = 44 }
  0x18   : > { %s242_s14 = sadd.s32 %s507_s13, %s240_s12 }
  0x19   : > { %s508_s15 = sshll.u32 %s242_s14, 2 }
  0x1a   : > { %s244_s26 = scalar_lea.vmem %s900_s0, %s508_s15 }
  0x1c   : > { %vm250_vm0 = vcmask 7168   ;;  %v705_v0 = vmov 0.0  }
  0x1d   : > { %251 = vst.msk [vmem:[#allocation2] sm:$0xff] %vm250_vm0, %v705_v0 }
  0x1e   : > { %252 = vst.msk [vmem:[#allocation2 + $0x8] sm:$0xff] %vm250_vm0, %v705_v0 }
  0x1f   : > { %253 = vst.msk [vmem:[#allocation2 + $0x10] sm:$0xff] %vm250_vm0, %v705_v0 }
  0x20   : > { %254 = vst.msk [vmem:[#allocation2 + $0x18] sm:$0xff] %vm250_vm0, %v705_v0 }
  0x21 PF: > { %v255_v1 = vld [vmem:[%s244_s26] sm:$0xf]  ;;  %vm302_vm1 = vcmask 1041408   ;;  %v263_v3 = vld [vmem:[%s902_s2 + $0x10] sm:$0xff]  ;;  %v706_v5 = vmov 0   ;;  %v525_v8 = vld [vmem:[%s901_s1 + $0x8] sm:$0xff] }
  0x22   : > { %v256_v2 = vpack.c.bf16 %v255_v1, %v255_v1  ;;  %v261_v4 = vld [vmem:[%s902_s2] sm:$0xff]  ;;  %602 = vset.pattern.permute.xlu1 %v706_v5  ;;  %601 = vset.pattern.permute.xlu0 %v706_v5  ;;  %vm295_vm2 = vcmask 31744   ;;  %v264_v9 = vld [vmem:[%s902_s2 + $0x18] sm:$0xff]  ;;  %v262_v10 = vld [vmem:[%s902_s2 + $0x8] sm:$0xff]  ;;  %vm345_vm3 = vcmask 7168   ;;  %p520_p1 = scmp.ne.s32.totalorder %s687_s21, 1 }
  0x23   : > { %v524_v7 = vld [vmem:[%s901_s1] sm:$0xff]  ;;  %277 = vperm.xlu1 %602, %v263_v3   ;;  %267 = vperm.xlu0 %601, %v261_v4  }
  0x24   : > { %v304_v6 = vsel %vm302_vm1, %v256_v2, 0  ;;  %v329_v28 = vld [vmem:[#allocation2] sm:$0xff] }
  0x25   : > { %313 = vmatpush.bf16.msra.mxu0 %v304_v6  ;;  %526 = vmatpush.bf16.msra.mxu1 %v304_v6  ;;  %v330_v34 = vld [vmem:[#allocation2 + $0x8] sm:$0xff] }
  0x26   : > { %v331_v27 = vld [vmem:[#allocation2 + $0x10] sm:$0xff] }
  0x27   : > { %v332_v33 = vld [vmem:[#allocation2 + $0x18] sm:$0xff] }
  0x28   : > { %518 = vmatmul.msk.bf16.vlgmr.msra.gmra.mxu0 %vm295_vm2, %v524_v7  ;;  %519 = vmatmul.msk.bf16.vlgmr.msra.gmra.mxu1 %vm295_vm2, %v525_v8 }
  0x2b   : > { %282 = vperm.xlu1 %602, %v264_v9   ;;  %272 = vperm.xlu0 %601, %v262_v10  }
  0x95   : > { %v278_v11 = vpop.permute.xlu1 %277  ;;  %v268_v12 = vpop.permute.xlu0 %267 }
  0x9d   : > { %v283_v19 = vpop.permute.xlu1 %282  ;;  %v273_v20 = vpop.permute.xlu0 %272 }
  0xa5   : > { %v315_v13 = vpop.f32.mrf.mxu0  ;;  %v320_v14 = vpop.f32.mrf.mxu1 }
  0xa6   : > { %v321_v15 = vadd.f32 %v320_v14, %v278_v11  ;;  %v316_v16 = vadd.f32 %v315_v13, %v268_v12 }
  0xa8   : > { %v327_v17 = vmax.f32 %v321_v15, 0.0  ;;  %v325_v18 = vmax.f32 %v316_v16, 0.0 }
  0xaa   : > { %337 = vadd.xlane.f32.xlu0 %v327_v17  ;;  %333 = vadd.xlane.f32.xlu2 %v325_v18 }
  0xad   : > { %v317_v21 = vpop.f32.mrf.mxu0  ;;  %v322_v22 = vpop.f32.mrf.mxu1 }
  0xae   : > { %v318_v23 = vadd.f32 %v317_v21, %v273_v20  ;;  %v323_v24 = vadd.f32 %v322_v22, %v283_v19 }
  0xb0   : > { %v326_v25 = vmax.f32 %v318_v23, 0.0  ;;  %v328_v26 = vmax.f32 %v323_v24, 0.0 }
  0xb2   : > { %339 = vadd.xlane.f32.xlu1 %v328_v26  ;;  %335 = vadd.xlane.f32.xlu2 %v326_v25 }
 0x11d   : > { %v338_v29 = vpop.xlane.xlu0 %337  ;;  %v334_v30 = vpop.xlane.xlu2 %333 }
 0x11e   : > { %v343_v31 = vadd.f32 %v338_v29, %v331_v27  ;;  %v341_v32 = vadd.f32 %v334_v30, %v329_v28 }
 0x120   : > { %348 = vst.msk [vmem:[#allocation2 + $0x10] sm:$0xff] %vm345_vm3, %v343_v31 }
 0x121   : > { %346 = vst.msk [vmem:[#allocation2] sm:$0xff] %vm345_vm3, %v341_v32 }
 0x125   : > { %v340_v35 = vpop.xlane.xlu1 %339  ;;  %v336_v36 = vpop.xlane.xlu2 %335  ;;  %353 = sbr.rel (%p520_p1) target bundleno = 474 (0x1da), region = 48 }
 0x126   : > { %v344_v37 = vadd.f32 %v340_v35, %v332_v33  ;;  %v342_v38 = vadd.f32 %v336_v36, %v330_v34 }
 0x128   : > { %349 = vst.msk [vmem:[#allocation2 + $0x18] sm:$0xff] %vm345_vm3, %v344_v37 }
 0x129   : > { %347 = vst.msk [vmem:[#allocation2 + $0x8] sm:$0xff] %vm345_vm3, %v342_v38 }
 0x12a   : > { %v356_v39 = vld [vmem:[#allocation2 + $0x10] sm:$0xff]  ;;  %v354_v40 = vld [vmem:[#allocation2] sm:$0xff]  ;;  %v707_v41 = vmov 0   ;;  %v359_v47 = vld [vmem:[%s903_s3 + $0x8] sm:$0xff] }
 0x12b   : > { %604 = vset.pattern.permute.xlu1 %v707_v41  ;;  %603 = vset.pattern.permute.xlu0 %v707_v41  ;;  %v358_v46 = vld [vmem:[%s903_s3] sm:$0xff]  ;;  %v360_v48 = vld [vmem:[%s903_s3 + $0x10] sm:$0xff]  ;;  %v361_v52 = vld [vmem:[%s903_s3 + $0x18] sm:$0xff] }
 0x12c   : > { %374 = vperm.xlu1 %604, %v356_v39   ;;  %364 = vperm.xlu0 %603, %v354_v40   ;;  %v395_v0 = vld [vmem:[%s904_s4] sm:$0x1] }
 0x12f   : > { %v357_v42 = vld [vmem:[#allocation2 + $0x18] sm:$0xff] }
 0x130   : > { %v355_v43 = vld [vmem:[#allocation2 + $0x8] sm:$0xff] }
 0x134   : > { %379 = vperm.xlu1 %604, %v357_v42   ;;  %369 = vperm.xlu0 %603, %v355_v43  }
 0x19e   : > { %v375_v44 = vpop.permute.xlu1 %374  ;;  %v365_v45 = vpop.permute.xlu0 %364 }
 0x19f   : > { %v382_v50 = vmul.f32 %v365_v45, %v358_v46  ;;  %v384_v54 = vmul.f32 %v375_v44, %v360_v48 }
 0x1a6   : > { %v370_v49 = vpop.permute.xlu0 %369  ;;  %v380_v53 = vpop.permute.xlu1 %379 }
 0x1a7   : > { %v383_v51 = vmul.f32 %v370_v49, %v359_v47  ;;  %v385_v56 = vmul.f32 %v380_v53, %v361_v52 }
 0x1a9   : > { %v386_v55 = vadd.f32 %v383_v51, %v382_v50 }
 0x1ab   : > { %v387_v57 = vadd.f32 %v386_v55, %v384_v54 }
 0x1ad   : > { %v388_v58 = vadd.f32 %v387_v57, %v385_v56 }
 0x1af   : > { %v389_v59 = vrot.slane %v388_v58, 4 }
 0x1b1   : > { %v390_v60 = vadd.f32 %v389_v59, %v388_v58 }
 0x1b3   : > { %v391_v61 = vrot.slane %v390_v60, 2 }
 0x1b5   : > { %v392_v62 = vadd.f32 %v391_v61, %v390_v60 }
 0x1b7   : > { %v393_v63 = vrot.slane %v392_v62, 1 }
 0x1b9   : > { %v394_v1 = vadd.f32 %v393_v63, %v392_v62 }
 0x1bb   : > { %v396_v2 = vadd.f32 %v395_v0, %v394_v1 }
 0x1bd   : > { %v521_v3 = vmul.f32 -1.442695, %v396_v2 }
 0x1bf   : > { %605 = vpow2.f32 %v521_v3 }
 0x1c5   : > { %v606_v4 = vpop.eup %605 }
 0x1c6   : > { %v400_v5 = vadd.f32 1.0, %v606_v4 }
 0x1c8   : > { %607 = vrcp.f32 %v400_v5  ;;  %v412_v9 = vand.u32 2147483648, %v400_v5  ;;  %v410_v11 = vand.u32 2147483647, %v400_v5  ;;  %vm406_vm5 = vweird.f32 %v400_v5 }
 0x1ca   : > { %v413_v13 = vor.u32 1.1754944e-38, %v412_v9  ;;  %vm411_vm7 = vcmp.eq.f32.partialorder %v410_v11, 8.507059e+37 }
 0x1ce   : > { %v608_v6 = vpop.eup %607 }
 0x1cf   : > { %v402_v7 = vmul.f32 %v608_v6, %v400_v5  ;;  %vm407_vm4 = vweird.f32 %v608_v6 }
 0x1d0   : > { %vm408_vm6 = vmor %vm406_vm5, %vm407_vm4 }
 0x1d1   : > { %v403_v8 = vsub.f32 1.0, %v402_v7 }
 0x1d3   : > { %v404_v10 = vmul.f32 %v608_v6, %v403_v8 }
 0x1d5   : > { %v405_v12 = vadd.f32 %v608_v6, %v404_v10 }
 0x1d7   : > { %v409_v14 = vsel %vm408_vm6, %v608_v6, %v405_v12 }
 0x1d8   : > { %v414_v15 = vsel %vm411_vm7, %v413_v13, %v409_v14 }
 0x1d9   : > { %416 = vst [vmem:[%s817_s27] sm:$0x1] %v414_v15 }
 0x1da PF: > { %s426_s12 = scalar_lea.hbm %s905_s5, %s691_s22  ;;  %s428_s13 = sshll.u32 %s817_s27, 4  ;;  %s429_s13 = int_to_ptr.vmem [resolvable:$true] %s428_s13 }
 0x1db   : > { %s430_s21 = sshll.u32 %s426_s12, 4  ;;  %s418_s14 = scalar_lea.sflag [#allocation4], %s235_s10  ;;  %s431_s21 = int_to_ptr.hbm [resolvable:$true] %s430_s21 }
 0x1dc   : > { %s623_s15 = sshra.s32 %s431_s21, 4  ;;  %s629_s7 = scalar_lea.hbm %s905_s5, 2  ;;  %s624_s15 = int_to_ptr.hbm [resolvable:$true] %s623_s15 }
 0x1dd   : > { %s625_s16 = scalar_lea.hbm %s624_s15, 1  ;;  %p630_p6 = scmp.lt.s32.totalorder %s624_s15, %s905_s5 }
 0x1de   : > { %p626_p2 = scmp.ne.s32.totalorder %s624_s15, %s625_s16  ;;  %p631_p7 = scmp.lt.s32.totalorder %s629_s7, %s625_s16 }
 0x1e0   : > { %p627_p4 = pnand %p626_p2, %p787_p3  ;;  %p632_p8 = por %p631_p7, %p630_p6 }
 0x1e2   : > { %p628_p5 = pneg %p627_p4 }
 0x1e4   : > { %p633_p10 = pnand %p632_p8, %p628_p5 }
 0x1e6   : > { %636 = shalt.err (!%p633_p10)
}
 0x1e7   : > { %527 = dma.vmem_to_hbm [thread:$0]  (%p787_p3), %s429_s13, 16, %s431_s21, %s418_s14  }
 0x1e8 PF: > { %p533_p11 = scmp.ge.s32.totalorder %s703_s25, 2  ;;  %s442_s22 = sand.u32 1, %s675_s18  }
 0x1e9   : > { %s443_s10 = scalar_lea.sflag [#allocation4], %s442_s22 }
 0x1ea   : > { %p530_p12 = pnand %p533_p11, %p797_p9 }
 0x1ec   : > { %p531_p13 = pneg %p530_p12 }
 0x1ee   : > { %670 = dma.done.wait (%p531_p13), %s443_s10, 16  }
 0x1ef   : > { %672 = vsyncadd (%p531_p13), %s443_s10, 4294967280  ;;  %s18_s25 = sadd.s32 1, %s703_s25   ;;  %s908_s18 = smov %s679_s19 }
 0x1f0   : > { %p15_p0 = scmp.ge.s32.totalorder %s18_s25, 6   ;;  %s909_s19 = smov %s683_s20 }
 0x1f1   : > { %s910_s20 = smov %s805_s9  ;;  %s911_s21 = smov %s695_s23 }
 0x1f2   : > { %s912_s22 = smov %s699_s24  ;;  %s913_s23 = smov %s916_s28 }
 0x1f3   : > { %s914_s24 = smov %s920_s29  ;;  %17 = sbr.rel (!%p15_p0) target bundleno = 5 (0x5), region = 83 }
 0x1f8   :  { %448 = vsyncpa [#allocation4], 1 }
 0x1f9   :  { %450 = vsyncpa [#allocation4 + $0x1], 1 }

// kernel: tpu_custom_call.1
= control target key start
LH: loop header
LB: loop body
LE: loop exit
PB: predicated region body
PF: predicated region fallthrough
CT: control target
= control target key end

     0   :  { %10 = vsyncpa [#allocation4], 0  ;;  %s900_s0 = inlined_call_operand.vmem [shape: f32[2,4,256], index: 0, kind: input, shape index: {}]   ;;  %s901_s1 = inlined_call_operand.vmem [shape: bf16[32,4], index: 1, kind: input, shape index: {}]   ;;  %s902_s2 = inlined_call_operand.vmem [shape: f32[32,1], index: 2, kind: input, shape index: {}]   ;;  %s903_s3 = inlined_call_operand.vmem [shape: f32[32,128], index: 3, kind: input, shape index: {}]   ;;  %s904_s4 = inlined_call_operand.vmem [shape: f32[1,128], index: 4, kind: input, shape index: {}]   ;;  %s905_s5 = inlined_call_operand.hbm [shape: f32[2,1,128], index: 5, kind: output, shape index: {}]  }
   0x1   :  { %12 = vsyncpa [#allocation4 + $0x1], 0  ;;  %s738_s18 = smov 0   ;;  %s740_s19 = smov 0  }
   0x2   :  { %s742_s20 = smov 0   ;;  %s744_s21 = smov 0  }
   0x3   :  { %s746_s22 = smov 0   ;;  %s748_s23 = smov 0  }
   0x4   :  { %s750_s24 = smov 0   ;;  %s752_s25 = smov 0  }
   0x5 LB: > { %s502_s26 = sadd.s32 4294967295, %s703_s25   ;;  %s503_s27 = sadd.s32 4294967294, %s703_s25   ;;  %s703_s25 = sphi %s752_s25, %s18_s25   ;;  %s699_s24 = sphi %s750_s24, %s914_s24   ;;  %s695_s23 = sphi %s748_s23, %s913_s23   ;;  %s691_s22 = sphi %s746_s22, %s912_s22   ;;  %s687_s21 = sphi %s744_s21, %s911_s21   ;;  %s683_s20 = sphi %s742_s20, %s910_s20   ;;  %s679_s19 = sphi %s740_s19, %s909_s19   ;;  %s675_s18 = sphi %s738_s18, %s908_s18  }
   0x6   : > { %s27_s28 = sadd.s32 1, %s695_s23  ;;  %s30_s29 = sadd.s32 1, %s699_s24 }
   0x7   : > { %p28_p0 = scmp.ge.s32.totalorder %s27_s28, 2  ;;  %p159_p1 = scmp.ne.s32.totalorder %s683_s20, %s679_s19 }
   0x8   : > { %p160_p2 = scmp.eq.s32.totalorder %s502_s26, 3  ;;  %p165_p4 = scmp.ne.s32.totalorder %s679_s19, %s675_s18 }
   0x9   : > { %s916_s28 = smov (%p28_p0, %s27_s28), 0  ;;  %s918_s29 = smov (!%p28_p0, %s30_s29), %s699_s24 }
   0xa   : > { %p787_p3 = por %p160_p2, %p159_p1  ;;  %p32_p5 = scmp.ge.s32.totalorder %s918_s29, 2 }
   0xb   : > { %p166_p6 = scmp.eq.s32.totalorder %s503_s27, 3  ;;  %p506_p7 = scmp.ge.s32.totalorder %s703_s25, 1 }
   0xc   : > { %p207_p8 = scmp.lt.s32.totalorder %s703_s25, 5  ;;  %s920_s29 = smov (%p32_p5, %s918_s29), 0 }
   0xd   : > { %p797_p9 = por %p166_p6, %p165_p4  ;;  %s146_s7 = ssub.s32 %s699_s24, %s920_s29 }
   0xe   : > { %p208_p10 = pnand %p506_p7, %p207_p8  ;;  %s149_s8 = sadd.s32 1, %s683_s20 }
   0xf   : > { %p147_p11 = scmp.eq.s32.totalorder %s146_s7, 0  ;;  %s235_s10 = sand.u32 (!%p208_p10), 1, %s679_s19  }
  0x10   : > { %211 = sbr.rel (%p208_p10) target bundleno = 488 (0x1e8), region = 40  ;;  %p237_p12 = scmp.lt.s32.totalorder (!%p208_p10), %s691_s22, 1 }
  0x11   : > { %s805_s9 = scalar_select %p147_p11, %s683_s20, %s149_s8  }
  0x12   : > { %p239_p13 = scmp.lt.s32.totalorder (!%p208_p10), %s687_s21, 1  ;;  %s817_s27 = scalar_lea.vmem (!%p208_p10), [#allocation3], %s235_s10 }
  0x13   : > { %p509_p0 = scmp.ne.s32.totalorder (!%p208_p10), %s687_s21, 0 }
  0x15   : > { %s238_s11 = scalar_select %p237_p12, %s691_s22, 1 }
  0x16   : > { %s240_s12 = scalar_select %p239_p13, %s687_s21, 1 }
  0x17   : > { %s507_s13 = sshll.u32 %s238_s11, 1  ;;  %249 = sbr.rel (%p509_p0) target bundleno = 33 (0x21), region = 44 }
  0x18   : > { %s242_s14 = sadd.s32 %s507_s13, %s240_s12 }
  0x19   : > { %s508_s15 = sshll.u32 %s242_s14, 2 }
  0x1a   : > { %s244_s26 = scalar_lea.vmem %s900_s0, %s508_s15 }
  0x1c   : > { %vm250_vm0 = vcmask 7168   ;;  %v705_v0 = vmov 0.0  }
  0x1d   : > { %251 = vst.msk [vmem:[#allocation2] sm:$0xff] %vm250_vm0, %v705_v0 }
  0x1e   : > { %252 = vst.msk [vmem:[#allocation2 + $0x8] sm:$0xff] %vm250_vm0, %v705_v0 }
  0x1f   : > { %253 = vst.msk [vmem:[#allocation2 + $0x10] sm:$0xff] %vm250_vm0, %v705_v0 }
  0x20   : > { %254 = vst.msk [vmem:[#allocation2 + $0x18] sm:$0xff] %vm250_vm0, %v705_v0 }
  0x21 PF: > { %v255_v1 = vld [vmem:[%s244_s26] sm:$0xf]  ;;  %vm302_vm1 = vcmask 1041408   ;;  %v263_v3 = vld [vmem:[%s902_s2 + $0x10] sm:$0xff]  ;;  %v706_v5 = vmov 0   ;;  %v525_v8 = vld [vmem:[%s901_s1 + $0x8] sm:$0xff] }
  0x22   : > { %v256_v2 = vpack.c.bf16 %v255_v1, %v255_v1  ;;  %v261_v4 = vld [vmem:[%s902_s2] sm:$0xff]  ;;  %602 = vset.pattern.permute.xlu1 %v706_v5  ;;  %601 = vset.pattern.permute.xlu0 %v706_v5  ;;  %vm295_vm2 = vcmask 31744   ;;  %v264_v9 = vld [vmem:[%s902_s2 + $0x18] sm:$0xff]  ;;  %v262_v10 = vld [vmem:[%s902_s2 + $0x8] sm:$0xff]  ;;  %vm345_vm3 = vcmask 7168   ;;  %p520_p1 = scmp.ne.s32.totalorder %s687_s21, 1 }
  0x23   : > { %v524_v7 = vld [vmem:[%s901_s1] sm:$0xff]  ;;  %277 = vperm.xlu1 %602, %v263_v3   ;;  %267 = vperm.xlu0 %601, %v261_v4  }
  0x24   : > { %v304_v6 = vsel %vm302_vm1, %v256_v2, 0  ;;  %v329_v28 = vld [vmem:[#allocation2] sm:$0xff] }
  0x25   : > { %313 = vmatpush.bf16.msra.mxu0 %v304_v6  ;;  %526 = vmatpush.bf16.msra.mxu1 %v304_v6  ;;  %v330_v34 = vld [vmem:[#allocation2 + $0x8] sm:$0xff] }
  0x26   : > { %v331_v27 = vld [vmem:[#allocation2 + $0x10] sm:$0xff] }
  0x27   : > { %v332_v33 = vld [vmem:[#allocation2 + $0x18] sm:$0xff] }
  0x28   : > { %518 = vmatmul.msk.bf16.vlgmr.msra.gmra.mxu0 %vm295_vm2, %v524_v7  ;;  %519 = vmatmul.msk.bf16.vlgmr.msra.gmra.mxu1 %vm295_vm2, %v525_v8 }
  0x2b   : > { %282 = vperm.xlu1 %602, %v264_v9   ;;  %272 = vperm.xlu0 %601, %v262_v10  }
  0x95   : > { %v278_v11 = vpop.permute.xlu1 %277  ;;  %v268_v12 = vpop.permute.xlu0 %267 }
  0x9d   : > { %v283_v19 = vpop.permute.xlu1 %282  ;;  %v273_v20 = vpop.permute.xlu0 %272 }
  0xa5   : > { %v315_v13 = vpop.f32.mrf.mxu0  ;;  %v320_v14 = vpop.f32.mrf.mxu1 }
  0xa6   : > { %v321_v15 = vadd.f32 %v320_v14, %v278_v11  ;;  %v316_v16 = vadd.f32 %v315_v13, %v268_v12 }
  0xa8   : > { %v327_v17 = vmax.f32 %v321_v15, 0.0  ;;  %v325_v18 = vmax.f32 %v316_v16, 0.0 }
  0xaa   : > { %337 = vadd.xlane.f32.xlu0 %v327_v17  ;;  %333 = vadd.xlane.f32.xlu2 %v325_v18 }
  0xad   : > { %v317_v21 = vpop.f32.mrf.mxu0  ;;  %v322_v22 = vpop.f32.mrf.mxu1 }
  0xae   : > { %v318_v23 = vadd.f32 %v317_v21, %v273_v20  ;;  %v323_v24 = vadd.f32 %v322_v22, %v283_v19 }
  0xb0   : > { %v326_v25 = vmax.f32 %v318_v23, 0.0  ;;  %v328_v26 = vmax.f32 %v323_v24, 0.0 }
  0xb2   : > { %339 = vadd.xlane.f32.xlu1 %v328_v26  ;;  %335 = vadd.xlane.f32.xlu2 %v326_v25 }
 0x11d   : > { %v338_v29 = vpop.xlane.xlu0 %337  ;;  %v334_v30 = vpop.xlane.xlu2 %333 }
 0x11e   : > { %v343_v31 = vadd.f32 %v338_v29, %v331_v27  ;;  %v341_v32 = vadd.f32 %v334_v30, %v329_v28 }
 0x120   : > { %348 = vst.msk [vmem:[#allocation2 + $0x10] sm:$0xff] %vm345_vm3, %v343_v31 }
 0x121   : > { %346 = vst.msk [vmem:[#allocation2] sm:$0xff] %vm345_vm3, %v341_v32 }
 0x125   : > { %v340_v35 = vpop.xlane.xlu1 %339  ;;  %v336_v36 = vpop.xlane.xlu2 %335  ;;  %353 = sbr.rel (%p520_p1) target bundleno = 474 (0x1da), region = 48 }
 0x126   : > { %v344_v37 = vadd.f32 %v340_v35, %v332_v33  ;;  %v342_v38 = vadd.f32 %v336_v36, %v330_v34 }
 0x128   : > { %349 = vst.msk [vmem:[#allocation2 + $0x18] sm:$0xff] %vm345_vm3, %v344_v37 }
 0x129   : > { %347 = vst.msk [vmem:[#allocation2 + $0x8] sm:$0xff] %vm345_vm3, %v342_v38 }
 0x12a   : > { %v356_v39 = vld [vmem:[#allocation2 + $0x10] sm:$0xff]  ;;  %v354_v40 = vld [vmem:[#allocation2] sm:$0xff]  ;;  %v707_v41 = vmov 0   ;;  %v359_v47 = vld [vmem:[%s903_s3 + $0x8] sm:$0xff] }
 0x12b   : > { %604 = vset.pattern.permute.xlu1 %v707_v41  ;;  %603 = vset.pattern.permute.xlu0 %v707_v41  ;;  %v358_v46 = vld [vmem:[%s903_s3] sm:$0xff]  ;;  %v360_v48 = vld [vmem:[%s903_s3 + $0x10] sm:$0xff]  ;;  %v361_v52 = vld [vmem:[%s903_s3 + $0x18] sm:$0xff] }
 0x12c   : > { %374 = vperm.xlu1 %604, %v356_v39   ;;  %364 = vperm.xlu0 %603, %v354_v40   ;;  %v395_v0 = vld [vmem:[%s904_s4] sm:$0x1] }
 0x12f   : > { %v357_v42 = vld [vmem:[#allocation2 + $0x18] sm:$0xff] }
 0x130   : > { %v355_v43 = vld [vmem:[#allocation2 + $0x8] sm:$0xff] }
 0x134   : > { %379 = vperm.xlu1 %604, %v357_v42   ;;  %369 = vperm.xlu0 %603, %v355_v43  }
 0x19e   : > { %v375_v44 = vpop.permute.xlu1 %374  ;;  %v365_v45 = vpop.permute.xlu0 %364 }
 0x19f   : > { %v382_v50 = vmul.f32 %v365_v45, %v358_v46  ;;  %v384_v54 = vmul.f32 %v375_v44, %v360_v48 }
 0x1a6   : > { %v370_v49 = vpop.permute.xlu0 %369  ;;  %v380_v53 = vpop.permute.xlu1 %379 }
 0x1a7   : > { %v383_v51 = vmul.f32 %v370_v49, %v359_v47  ;;  %v385_v56 = vmul.f32 %v380_v53, %v361_v52 }
 0x1a9   : > { %v386_v55 = vadd.f32 %v383_v51, %v382_v50 }
 0x1ab   : > { %v387_v57 = vadd.f32 %v386_v55, %v384_v54 }
 0x1ad   : > { %v388_v58 = vadd.f32 %v387_v57, %v385_v56 }
 0x1af   : > { %v389_v59 = vrot.slane %v388_v58, 4 }
 0x1b1   : > { %v390_v60 = vadd.f32 %v389_v59, %v388_v58 }
 0x1b3   : > { %v391_v61 = vrot.slane %v390_v60, 2 }
 0x1b5   : > { %v392_v62 = vadd.f32 %v391_v61, %v390_v60 }
 0x1b7   : > { %v393_v63 = vrot.slane %v392_v62, 1 }
 0x1b9   : > { %v394_v1 = vadd.f32 %v393_v63, %v392_v62 }
 0x1bb   : > { %v396_v2 = vadd.f32 %v395_v0, %v394_v1 }
 0x1bd   : > { %v521_v3 = vmul.f32 -1.442695, %v396_v2 }
 0x1bf   : > { %605 = vpow2.f32 %v521_v3 }
 0x1c5   : > { %v606_v4 = vpop.eup %605 }
 0x1c6   : > { %v400_v5 = vadd.f32 1.0, %v606_v4 }
 0x1c8   : > { %607 = vrcp.f32 %v400_v5  ;;  %v412_v9 = vand.u32 2147483648, %v400_v5  ;;  %v410_v11 = vand.u32 2147483647, %v400_v5  ;;  %vm406_vm5 = vweird.f32 %v400_v5 }
 0x1ca   : > { %v413_v13 = vor.u32 1.1754944e-38, %v412_v9  ;;  %vm411_vm7 = vcmp.eq.f32.partialorder %v410_v11, 8.507059e+37 }
 0x1ce   : > { %v608_v6 = vpop.eup %607 }
 0x1cf   : > { %v402_v7 = vmul.f32 %v608_v6, %v400_v5  ;;  %vm407_vm4 = vweird.f32 %v608_v6 }
 0x1d0   : > { %vm408_vm6 = vmor %vm406_vm5, %vm407_vm4 }
 0x1d1   : > { %v403_v8 = vsub.f32 1.0, %v402_v7 }
 0x1d3   : > { %v404_v10 = vmul.f32 %v608_v6, %v403_v8 }
 0x1d5   : > { %v405_v12 = vadd.f32 %v608_v6, %v404_v10 }
 0x1d7   : > { %v409_v14 = vsel %vm408_vm6, %v608_v6, %v405_v12 }
 0x1d8   : > { %v414_v15 = vsel %vm411_vm7, %v413_v13, %v409_v14 }
 0x1d9   : > { %416 = vst [vmem:[%s817_s27] sm:$0x1] %v414_v15 }
 0x1da PF: > { %s426_s12 = scalar_lea.hbm %s905_s5, %s691_s22  ;;  %s428_s13 = sshll.u32 %s817_s27, 4  ;;  %s429_s13 = int_to_ptr.vmem [resolvable:$true] %s428_s13 }
 0x1db   : > { %s430_s21 = sshll.u32 %s426_s12, 4  ;;  %s418_s14 = scalar_lea.sflag [#allocation4], %s235_s10  ;;  %s431_s21 = int_to_ptr.hbm [resolvable:$true] %s430_s21 }
 0x1dc   : > { %s623_s15 = sshra.s32 %s431_s21, 4  ;;  %s629_s7 = scalar_lea.hbm %s905_s5, 2  ;;  %s624_s15 = int_to_ptr.hbm [resolvable:$true] %s623_s15 }
 0x1dd   : > { %s625_s16 = scalar_lea.hbm %s624_s15, 1  ;;  %p630_p6 = scmp.lt.s32.totalorder %s624_s15, %s905_s5 }
 0x1de   : > { %p626_p2 = scmp.ne.s32.totalorder %s624_s15, %s625_s16  ;;  %p631_p7 = scmp.lt.s32.totalorder %s629_s7, %s625_s16 }
 0x1e0   : > { %p627_p4 = pnand %p626_p2, %p787_p3  ;;  %p632_p8 = por %p631_p7, %p630_p6 }
 0x1e2   : > { %p628_p5 = pneg %p627_p4 }
 0x1e4   : > { %p633_p10 = pnand %p632_p8, %p628_p5 }
 0x1e6   : > { %636 = shalt.err (!%p633_p10)
}
 0x1e7   : > { %527 = dma.vmem_to_hbm [thread:$0]  (%p787_p3), %s429_s13, 16, %s431_s21, %s418_s14  }
 0x1e8 PF: > { %p533_p11 = scmp.ge.s32.totalorder %s703_s25, 2  ;;  %s442_s22 = sand.u32 1, %s675_s18  }
 0x1e9   : > { %s443_s10 = scalar_lea.sflag [#allocation4], %s442_s22 }
 0x1ea   : > { %p530_p12 = pnand %p533_p11, %p797_p9 }
 0x1ec   : > { %p531_p13 = pneg %p530_p12 }
 0x1ee   : > { %670 = dma.done.wait (%p531_p13), %s443_s10, 16  }
 0x1ef   : > { %672 = vsyncadd (%p531_p13), %s443_s10, 4294967280  ;;  %s18_s25 = sadd.s32 1, %s703_s25   ;;  %s908_s18 = smov %s679_s19 }
 0x1f0   : > { %p15_p0 = scmp.ge.s32.totalorder %s18_s25, 6   ;;  %s909_s19 = smov %s683_s20 }
 0x1f1   : > { %s910_s20 = smov %s805_s9  ;;  %s911_s21 = smov %s695_s23 }
 0x1f2   : > { %s912_s22 = smov %s699_s24  ;;  %s913_s23 = smov %s916_s28 }
 0x1f3   : > { %s914_s24 = smov %s920_s29  ;;  %17 = sbr.rel (!%p15_p0) target bundleno = 5 (0x5), region = 83 }
 0x1f8   :  { %448 = vsyncpa [#allocation4], 1 }
 0x1f9   :  { %450 = vsyncpa [#allocation4 + $0x1], 1 }

</bundles_post_ra>
